<compile_context>
chip_gen: v5e
topology: v5e:2x2
jax: 0.10.0
libtpu: 0.0.40
codegen_flags: <defaults>
</compile_context>

<pallas_src>
import jax
import jax.numpy as jnp
from jax import lax
from jax.experimental import pallas as pl
from jax.experimental.pallas import tpu as pltpu

EPS = 1e-5


# --------------------------------------------------------------------------- tiling
def _pick_tq(Hq, Wq, cap_tm=4096):
    """Largest q-row tile TQ (divisor of Hq) with lane-dense TM = TQ*Wq."""
    cands = [tq for tq in range(1, Hq + 1)
             if Hq % tq == 0 and (tq == Hq or (tq * Wq) % 128 == 0)]
    fit = [tq for tq in cands if tq * Wq <= cap_tm]
    return max(fit) if fit else min(cands)


def _pick_rows_block(rows, cc, L, itemsize, budget_bytes=1 << 20):
    """Pass-2 row block: multiple of cc (scale/shift tile cleanly), sublane aligned."""
    if rows * L * itemsize <= budget_bytes:
        return rows
    n = rows // cc
    best = rows
    for k in range(1, n + 1):
        if n % k:
            continue
        rb = k * cc
        if rb % 8 != 0 and rb != rows:
            continue
        if rb * L * itemsize <= budget_bytes:
            best = rb
    return best


# --------------------------------------------------------------------------- kernels
def _conv_stats_kernel(col_ref, wT_ref, y_ref, stats_ref):
    """Pass 1: y = WmatT @ col on the MXU + packed per-tile BN partial sums.

      col_ref   : (1, Kc, TM)  im2col slab (contraction-major, lanes = spatial)
      wT_ref    : (CC, Kc)     phase-packed, pre-transposed ConvTranspose2d weight
      y_ref     : (1, CC, TM)  conv tile, channel-major, lane-dense
      stats_ref : (1, CC, 2)   [sum, sum-of-squares] per (phase, channel) row
    """
    y = jnp.dot(wT_ref[...], col_ref[0],
                preferred_element_type=jnp.float32)            # (CC, TM) f32
    ssum = jnp.sum(y, axis=1, keepdims=True)                    # (CC, 1)
    ssq = jnp.sum(y * y, axis=1, keepdims=True)                 # (CC, 1)
    stats_ref[...] = jnp.concatenate((ssum, ssq), axis=1)[None]
    y_ref[...] = y[None].astype(y_ref.dtype)


def _bn_relu_kernel(y_ref, scale_ref, shift_ref, o_ref):
    """Pass 2: lane-dense fused scale/shift + ReLU over (RB, L) row blocks."""
    o_ref[...] = jnp.maximum(
        y_ref[...] * scale_ref[...] + shift_ref[...], 0.0).astype(o_ref.dtype)


# --------------------------------------------------------------------------- wrapper
def up_conv_block(x_nchw, weight, bias, gamma, beta, *,
                  stride, padding, output_padding,
                  compute_dtype=jnp.float32):
    """weight: (Cin, Cout, K, K), exactly torch.nn.ConvTranspose2d.weight layout."""
    N, Cin, H, W = x_nchw.shape
    Cout = weight.shape[1]
    K = weight.shape[2]
    s, p, op = stride, padding, output_padding
    lo = K - 1 - p
    assert lo >= 0, "requires padding <= kernel_size - 1"

    Ho = (H - 1) * s - 2 * p + K + op
    Wo = (W - 1) * s - 2 * p + K + op
    # TODO(synk): Ho/Wo not divisible by stride needs output cropping + masked BN
    # statistics; not needed for CycleGAN upsampling configs (k=3, s=2, p=1, op=1).
    assert Ho % s == 0 and Wo % s == 0
    Hq, Wq = Ho // s, Wo // s

    # ---- phase (sub-pixel) decomposition geometry ---------------------------------
    dys = [(r + i - lo) // s
           for r in range(s) for i in range(K) if (i - (lo - r)) % s == 0]
    dy_min, dy_max = min(dys), max(dys)
    KB = dy_max - dy_min + 1          # unified sub-filter extent
    pt = max(0, -dy_min)              # top/left halo of the (un-dilated) input
    base = dy_min + pt                # first input row read for output q-row 0
    pb_h = max(0, (Hq + base + KB - 1) - (pt + H))
    pb_w = max(0, (Wq + base + KB - 1) - (pt + W))

    CC = s * s * Cout
    Kc = KB * KB * Cin
    L = Hq * Wq

    # ---- pack ConvTranspose2d weight into WmatT : (CC, Kc) ------------------------
    wbig = jnp.zeros((KB, KB, Cin, s, s, Cout), jnp.float32)
    for ry in range(s):
        for my in range(KB):
            i = lo - ry + s * (my + dy_min)
            if not (0 <= i < K):
                continue
            for rx in range(s):
                for mx in range(KB):
                    j = lo - rx + s * (mx + dy_min)
                    if not (0 <= j < K):
                        continue
                    wbig = wbig.at[my, mx, :, ry, rx, :].set(
                        weight[:, :, K - 1 - i, K - 1 - j].astype(jnp.float32))
    wmatT = wbig.reshape(Kc, CC).T.astype(compute_dtype)        # (CC, Kc)

    # Conv bias dropped on purpose: training-mode BatchNorm mean subtraction cancels it.
    del bias

    # ---- wrapper-side phase im2col (pure slicing, lane-dense presentation) --------
    x = jnp.transpose(x_nchw, (0, 2, 3, 1))
    x = jnp.pad(x, ((0, 0), (pt, pb_h), (pt, pb_w), (0, 0)))
    taps = []
    for my in range(KB):
        for mx in range(KB):
            win = lax.slice(x, (0, base + my, base + mx, 0),
                            (N, base + my + Hq, base + mx + Wq, Cin))
            taps.append(jnp.transpose(win, (0, 3, 1, 2)).reshape(N, Cin, L))
    xcol = jnp.concatenate(taps, axis=1).astype(compute_dtype)   # (N, Kc, L)

    # ---- pass 1: channel-major conv tile + packed partial BN stats ----------------
    TQ = _pick_tq(Hq, Wq)
    n_qt = Hq // TQ
    TM = TQ * Wq
    G = N * n_qt
    y_dtype = jnp.float32 if compute_dtype == jnp.float32 else compute_dtype

    y, stats = pl.pallas_call(
        _conv_stats_kernel,
        grid=(N, n_qt),
        in_specs=[
            pl.BlockSpec((1, Kc, TM), lambda n, t: (n, 0, t)),
            pl.BlockSpec((CC, Kc), lambda n, t: (0, 0)),
        ],
        out_specs=(
            pl.BlockSpec((1, CC, TM), lambda n, t: (n, 0, t)),
            pl.BlockSpec((1, CC, 2), lambda n, t: (n * n_qt + t, 0, 0)),
        ),
        out_shape=(
            jax.ShapeDtypeStruct((N, CC, L), y_dtype),
            jax.ShapeDtypeStruct((G, CC, 2), jnp.float32),
        ),
        compiler_params=pltpu.CompilerParams(
            dimension_semantics=("parallel", "parallel")),
    )(xcol, wmatT)

    # ---- fold BN (global batch stats, biased var) into one FMA --------------------
    st = jnp.sum(stats, axis=0)                                  # (CC, 2)
    sum_c = st[:, 0].reshape(s * s, Cout).sum(axis=0)
    sq_c = st[:, 1].reshape(s * s, Cout).sum(axis=0)
    count = jnp.float32(N * Ho * Wo)
    mean = sum_c / count
    # TODO(synk): E[x^2]-E[x]^2 is cancellation-prone; use Welford / two-pass for
    # production activation scales.
    var = jnp.maximum(sq_c / count - mean * mean, 0.0)
    scale = gamma.astype(jnp.float32) * lax.rsqrt(var + EPS)
    shift = beta.astype(jnp.float32) - mean * scale
    scale_cc = jnp.tile(scale, s * s)                            # rows = (ry, rx, co)
    shift_cc = jnp.tile(shift, s * s)

    # ---- pass 2: coarse lane-dense scale/shift + ReLU (in place via aliasing) -----
    rows = N * CC
    y2 = y.reshape(rows, L)
    out_dtype = x_nchw.dtype
    RB = _pick_rows_block(rows, CC, L, jnp.dtype(y_dtype).itemsize)
    scale_rb = jnp.tile(scale_cc, RB // CC).reshape(RB, 1)
    shift_rb = jnp.tile(shift_cc, RB // CC).reshape(RB, 1)

    alias = {0: 0} if jnp.dtype(y_dtype) == jnp.dtype(out_dtype) else {}
    out2 = pl.pallas_call(
        _bn_relu_kernel,
        grid=(rows // RB,),
        in_specs=[
            pl.BlockSpec((RB, L), lambda g: (g, 0)),
            pl.BlockSpec((RB, 1), lambda g: (0, 0)),
            pl.BlockSpec((RB, 1), lambda g: (0, 0)),
        ],
        out_specs=pl.BlockSpec((RB, L), lambda g: (g, 0)),
        out_shape=jax.ShapeDtypeStruct((rows, L), out_dtype),
        input_output_aliases=alias,
        compiler_params=pltpu.CompilerParams(
            dimension_semantics=("parallel",)),
    )(y2, scale_rb, shift_rb)

    # ---- un-interleave phases into NCHW (ONE fused XLA reshape+transpose) ---------
    # TODO(synk): if the consumer accepts pixel-shuffle (phase-major) layout, this
    # single extra read+write of the output can be dropped entirely.
    out = out2.reshape(N, s, s, Cout, Hq, Wq)
    out = out.transpose(0, 3, 4, 1, 5, 2).reshape(N, Cout, Ho, Wo)
    return out


# --------------------------------------------------------------------------- reference
def reference(x_nchw, weight, bias, gamma, beta, *,
              stride, padding, output_padding):
    """Pure-JAX reference (XLA conv) for sanity checking."""
    x = jnp.transpose(x_nchw, (0, 2, 3, 1))
    K = weight.shape[2]
    w_conv = jnp.transpose(weight[:, :, ::-1, ::-1], (2, 3, 0, 1))
    lo = K - 1 - padding
    hi = lo + output_padding
    y = lax.conv_general_dilated(
        x, w_conv, window_strides=(1, 1),
        padding=((lo, hi), (lo, hi)),
        lhs_dilation=(stride, stride),
        dimension_numbers=('NHWC', 'HWIO', 'NHWC'))
    y = y + bias
    mean = jnp.mean(y, axis=(0, 1, 2), keepdims=True)
    var = jnp.mean((y - mean) ** 2, axis=(0, 1, 2), keepdims=True)
    y = (y - mean) * lax.rsqrt(var + EPS) * gamma + beta
    y = jnp.maximum(y, 0.0)
    return jnp.transpose(y, (0, 3, 1, 2))


if __name__ == "__main__":
    # Upsampling CycleGAN block: in_channels=4, out_channels=8, kernel_size=3,
    # stride=2, padding=1, output_padding=1  ->  16x16 -> 32x32
    N, Cin, H, W = 2, 4, 16, 16
    Cout, K, stride, padding, output_padding = 8, 3, 2, 1, 1

    key = jax.random.PRNGKey(0)
    kx, kw, kb, kg, kbe = jax.random.split(key, 5)

    x = jax.random.normal(kx, (N, Cin, H, W), jnp.float32)
    fan_in = Cin * K * K
    weight = jax.random.normal(kw, (Cin, Cout, K, K), jnp.float32) / jnp.sqrt(fan_in)
    bias = 0.1 * jax.random.normal(kb, (Cout,), jnp.float32)
    gamma = 1.0 + 0.1 * jax.random.normal(kg, (Cout,), jnp.float32)
    beta = 0.1 * jax.random.normal(kbe, (Cout,), jnp.float32)

    out = up_conv_block(x, weight, bias, gamma, beta,
                        stride=stride, padding=padding,
                        output_padding=output_padding)
    out = jax.block_until_ready(out)

    ref = reference(x, weight, bias, gamma, beta,
                    stride=stride, padding=padding,
                    output_padding=output_padding)
    assert out.shape == (N, Cout, 32, 32), out.shape
    assert jnp.allclose(out, ref, atol=1e-3, rtol=1e-3), "mismatch vs JAX reference"

    print("KERNEL_OK")
</pallas_src>

<mosaic_0001>
module attributes {stable_mosaic.version = 11 : i64} {
  func.func @_conv_stats_kernel(%arg0: i32, %arg1: i32, %arg2: memref<1x16x256xf32, #tpu.memory_space<vmem>>, %arg3: memref<32x16xf32, #tpu.memory_space<vmem>>, %arg4: memref<1x32x256xf32, #tpu.memory_space<vmem>>, %arg5: memref<1x32x2xf32, #tpu.memory_space<vmem>>) attributes {dimension_semantics = [#tpu.dimension_semantics<parallel>, #tpu.dimension_semantics<parallel>], iteration_bounds = array<i64: 2, 1>, scalar_prefetch = 0 : i64, scratch_operands = 0 : i64, tpu.core_type = #tpu.core_type<tc>, window_params = [{transform_indices = @transform_0, window_bounds = array<i64: 1, 16, 256>}, {pipeline_mode = #tpu.pipeline_mode<synchronous>, transform_indices = @transform_1, window_bounds = array<i64: 32, 16>}, {transform_indices = @transform_2, window_bounds = array<i64: 1, 32, 256>}, {transform_indices = @transform_3, window_bounds = array<i64: 1, 32, 2>}]} {
    %c0 = arith.constant 0 : index
    %c0_0 = arith.constant 0 : index
    %0 = vector.load %arg3[%c0, %c0_0] : memref<32x16xf32, #tpu.memory_space<vmem>>, vector<32x16xf32>
    %c0_1 = arith.constant 0 : index
    %c0_2 = arith.constant 0 : index
    %c0_3 = arith.constant 0 : index
    %1 = vector.load %arg2[%c0_1, %c0_2, %c0_3] : memref<1x16x256xf32, #tpu.memory_space<vmem>>, vector<1x16x256xf32>
    %2 = vector.shape_cast %1 : vector<1x16x256xf32> to vector<16x256xf32>
    %cst = arith.constant dense<0.000000e+00> : vector<32x256xf32>
    %3 = tpu.matmul %0, %2, %cst {dimension_numbers = #tpu.dot_dimension_numbers<[1], [0], [0], [1], [0, 0, 1, 1], [], []>} : vector<32x16xf32>, vector<16x256xf32>, vector<32x256xf32> -> vector<32x256xf32>
    %cst_4 = arith.constant dense<0.000000e+00> : vector<32xf32>
    %4 = vector.multi_reduction <add>, %3, %cst_4 [1] : vector<32x256xf32> to vector<32xf32>
    %5 = vector.shape_cast %4 : vector<32xf32> to vector<32x1xf32>
    %6 = arith.mulf %3, %3 : vector<32x256xf32>
    %cst_5 = arith.constant dense<0.000000e+00> : vector<32xf32>
    %7 = vector.multi_reduction <add>, %6, %cst_5 [1] : vector<32x256xf32> to vector<32xf32>
    %8 = vector.shape_cast %7 : vector<32xf32> to vector<32x1xf32>
    %9 = tpu.concatenate %5, %8 in 1 : vector<32x1xf32>, vector<32x1xf32> -> vector<32x2xf32>
    %10 = vector.shape_cast %9 : vector<32x2xf32> to vector<1x32x2xf32>
    %c0_6 = arith.constant 0 : index
    %c0_7 = arith.constant 0 : index
    %c0_8 = arith.constant 0 : index
    %11 = vector.load %arg5[%c0_6, %c0_7, %c0_8] : memref<1x32x2xf32, #tpu.memory_space<vmem>>, vector<1x32x2xf32>
    tpu.vector_store %arg5[%c0_6, %c0_7, %c0_8], %10 {strides = array<i32>} : memref<1x32x2xf32, #tpu.memory_space<vmem>>, vector<1x32x2xf32>,
    %12 = vector.shape_cast %3 : vector<32x256xf32> to vector<1x32x256xf32>
    %c0_9 = arith.constant 0 : index
    %c0_10 = arith.constant 0 : index
    %c0_11 = arith.constant 0 : index
    %13 = vector.load %arg4[%c0_9, %c0_10, %c0_11] : memref<1x32x256xf32, #tpu.memory_space<vmem>>, vector<1x32x256xf32>
    tpu.vector_store %arg4[%c0_9, %c0_10, %c0_11], %12 {strides = array<i32>} : memref<1x32x256xf32, #tpu.memory_space<vmem>>, vector<1x32x256xf32>,
    return
  }
  func.func @transform_0(%arg0: i32, %arg1: i32) -> (i32, i32, i32) {
    %c0_i32 = arith.constant 0 : i32
    %c0_i32_0 = arith.constant 0 : i32
    return %arg0, %c0_i32, %arg1 : i32, i32, i32
  }
  func.func @transform_1(%arg0: i32, %arg1: i32) -> (i32, i32) {
    %c0_i32 = arith.constant 0 : i32
    %c0_i32_0 = arith.constant 0 : i32
    %c0_i32_1 = arith.constant 0 : i32
    return %c0_i32, %c0_i32_0 : i32, i32
  }
  func.func @transform_2(%arg0: i32, %arg1: i32) -> (i32, i32, i32) {
    %c0_i32 = arith.constant 0 : i32
    %c0_i32_0 = arith.constant 0 : i32
    return %arg0, %c0_i32, %arg1 : i32, i32, i32
  }
  func.func @transform_3(%arg0: i32, %arg1: i32) -> (i32, i32, i32) {
    %c1_i32 = arith.constant 1 : i32
    %0 = arith.muli %arg0, %c1_i32 : i32
    %1 = arith.addi %0, %arg1 : i32
    %c0_i32 = arith.constant 0 : i32
    %c0_i32_0 = arith.constant 0 : i32
    %c0_i32_1 = arith.constant 0 : i32
    return %1, %c0_i32, %c0_i32_0 : i32, i32, i32
  }
}

</mosaic_0001>

<bundles_post_ra>
// kernel: tpu_custom_call.1
= control target key start
LH: loop header
LB: loop body
LE: loop exit
PB: predicated region body
PF: predicated region fallthrough
CT: control target
= control target key end

     0   :  { %9 = vsyncpa [#allocation3], 0  ;;  %s891_s0 = inlined_call_operand.hbm [shape: f32[2,16,256], index: 0, kind: input, shape index: {}]   ;;  %s892_s1 = inlined_call_operand.vmem [shape: f32[32,16], index: 1, kind: input, shape index: {}]   ;;  %s893_s2 = inlined_call_operand.hbm [shape: f32[2,32,256], index: 2, kind: output, shape index: {0}]   ;;  %s894_s3 = inlined_call_operand.vmem [shape: f32[2,32,2], index: 3, kind: output, shape index: {1}]  }
   0x1   :  { %11 = vsyncpa [#allocation3 + $0x1], 0 }
   0x2   :  { %12 = vsyncpa [#allocation4], 0 }
   0x3   :  { %14 = vsyncpa [#allocation4 + $0x1], 0  ;;  %s735_s12 = smov 0   ;;  %s737_s13 = smov 0  }
   0x4   :  { %s739_s14 = smov 0   ;;  %s741_s15 = smov 0  }
   0x5   :  { %s743_s16 = smov 0   ;;  %s745_s17 = smov 0  }
   0x6 LB: > { %s499_s18 = sadd.s32 4294967295, %s709_s17   ;;  %s500_s19 = sadd.s32 4294967294, %s709_s17   ;;  %s709_s17 = sphi %s745_s17, %s20_s17   ;;  %s705_s16 = sphi %s743_s16, %s903_s16   ;;  %s701_s15 = sphi %s741_s15, %s902_s15   ;;  %s697_s14 = sphi %s739_s14, %s901_s14   ;;  %s693_s13 = sphi %s737_s13, %s900_s13   ;;  %s689_s12 = sphi %s735_s12, %s899_s12  }
   0x7   : > { %s32_s20 = sadd.s32 1, %s705_s16  ;;  %s41_s21 = sadd.s32 1, %s697_s14 }
   0x8   : > { %p34_p0 = scmp.ge.s32.totalorder %s32_s20, 2  ;;  %p48_p1 = scmp.ne.s32.totalorder %s697_s14, %s693_s13 }
   0x9   : > { %p49_p2 = scmp.eq.s32.totalorder %s709_s17, 0  ;;  %p54_p3 = scmp.ne.s32.totalorder %s693_s13, %s689_s12 }
   0xa   : > { %s905_s20 = smov (%p34_p0, %s32_s20), 0  ;;  %p55_p5 = scmp.eq.s32.totalorder %s499_s18, 0 }
   0xb   : > { %p776_p4 = por %p49_p2, %p48_p1  ;;  %s36_s23 = ssub.s32 %s705_s16, %s905_s20 }
   0xc   : > { %p101_p6 = scmp.eq.s32.totalorder %s499_s18, 1  ;;  %p39_p7 = scmp.eq.s32.totalorder %s36_s23, 0 }
   0xd   : > { %p782_p8 = por %p55_p5, %p54_p3  ;;  %p107_p10 = scmp.eq.s32.totalorder %s500_s19, 1 }
   0xe   : > { %p786_p9 = por %p101_p6, %p48_p1  ;;  %p502_p12 = scmp.ge.s32.totalorder %s709_s17, 2 }
   0xf   : > { %s791_s26 = scalar_select %p39_p7, %s697_s14, %s41_s21  }
  0x10   : > { %p793_p11 = por %p107_p10, %p54_p3  ;;  %p543_p13 = scmp.lt.s32.totalorder %s709_s17, 2 }
  0x11   : > { %s158_s28 = sand.u32 1, %s697_s14   ;;  %s524_s30 = sshll.u32 %s705_s16, 5 }
  0x12   : > { %s503_s29 = sshll.u32 %s158_s28, 5  ;;  %s169_s6 = scalar_lea.hbm %s891_s0, %s524_s30 }
  0x13   : > { %s162_s7 = scalar_lea.vmem [#allocation2], %s503_s29  ;;  %s170_s9 = sshll.u32 %s169_s6, 4  ;;  %s171_s9 = int_to_ptr.hbm [resolvable:$true] %s170_s9 }
  0x14   : > { %s172_s8 = sshll.u32 %s162_s7, 4  ;;  %p536_p0 = pnand %p543_p13, %p776_p4  ;;  %s173_s8 = int_to_ptr.vmem [resolvable:$true] %s172_s8 }
  0x15   : > { %p506_p1 = scmp.ge.s32.totalorder %s709_s17, 1  ;;  %s159_s10 = scalar_lea.sflag [#allocation3], %s158_s28 }
  0x16   : > { %s711_s11 = smov 256   ;;  %s712_s18 = smov 16  }
  0x17   : > { %538 = dma.hbm_to_vmem [thread:$0]  (!%p536_p0), %s171_s9, 512, %s173_s8, %s159_s10, %s711_s11, %s711_s11, %s712_s18  }
  0x18   : > { %p180_p2 = scmp.lt.s32.totalorder %s709_s17, 3 }
  0x1a   : > { %p181_p3 = pnand %p506_p1, %p180_p2 }
  0x1b   : > { %s809_s19 = sand.u32 (!%p181_p3), 1, %s693_s13  }
  0x1c   : > { %184 = sbr.rel (%p181_p3) target bundleno = 308 (0x134), region = 28  ;;  %s507_s21 = sshll.u32 (!%p181_p3), %s809_s19, 5 }
  0x1d   : > { %s187_s23 = scalar_lea.sflag (!%p181_p3), [#allocation3], %s809_s19  ;;  %s190_s29 = scalar_lea.vmem (!%p181_p3), [#allocation2], %s507_s21 }
  0x21   : > { %680 = dma.done.wait (%p782_p8), %s187_s23, 512  }
  0x22   : > { %682 = vsyncadd (%p782_p8), %s187_s23, 4294966784  ;;  %v235_v0 = vld [vmem:[%s190_s29 + $0x10] sm:$0xff]  ;;  %v236_v1 = vld [vmem:[%s190_s29 + $0x18] sm:$0xff]  ;;  %vm237_vm0 = vcmask 130048   ;;  %s508_s8 = sshll.u32 %s809_s19, 6  ;;  %s526_s11 = sshll.u32 %s701_s15, 6 }
  0x23   : > { %v233_v2 = vld [vmem:[%s190_s29] sm:$0xff]  ;;  %264 = vmatpush.msra.mxu0 %v235_v0  ;;  %527 = vmatpush.msra.mxu2 %v235_v0  ;;  %v234_v3 = vld [vmem:[%s190_s29 + $0x8] sm:$0xff]  ;;  %v231_v5 = vld [vmem:[%s892_s1 + $0x10] sm:$0xff]  ;;  %s830_s9 = scalar_lea.vmem [#allocation5], %s508_s8  ;;  %s378_s23 = scalar_lea.hbm %s893_s2, %s526_s11 }
  0x24   : > { %293 = vmatpush.msra.mxu1 %v236_v1  ;;  %529 = vmatpush.msra.mxu3 %v236_v1  ;;  %v229_v4 = vld [vmem:[%s892_s1] sm:$0xff]  ;;  %v230_v6 = vld [vmem:[%s892_s1 + $0x8] sm:$0xff]  ;;  %v232_v7 = vld [vmem:[%s892_s1 + $0x18] sm:$0xff]  ;;  %s379_s10 = sshll.u32 %s830_s9, 4  ;;  %s381_s29 = sshll.u32 %s378_s23, 4  ;;  %s843_s10 = int_to_ptr.vmem [resolvable:$true] %s379_s10  ;;  %s382_s29 = int_to_ptr.hbm [resolvable:$true] %s381_s29 }
  0x25   : > { %265 = vmatpush.msra.mxu0 %v233_v2  ;;  %528 = vmatpush.msra.mxu2 %v233_v2  ;;  %s359_s22 = scalar_lea.sflag [#allocation4], %s809_s19  ;;  %s641_s28 = sshra.s32 %s382_s29, 4  ;;  %s642_s28 = int_to_ptr.hbm [resolvable:$true] %s641_s28 }
  0x26   : > { %294 = vmatpush.msra.mxu1 %v234_v3  ;;  %530 = vmatpush.msra.mxu3 %v234_v3  ;;  %s643_s30 = scalar_lea.hbm %s642_s28, 64  ;;  %s647_s5 = scalar_lea.hbm %s893_s2, 128 }
  0x27   : > { %511 = vmatmul.msk.f32.vlgmr.msra.gmra.mxu0 %vm237_vm0, %v229_v4  ;;  %513 = vmatmul.msk.f32.vlgmr.msra.gmra.mxu2 %vm237_vm0, %v231_v5  ;;  %p644_p4 = scmp.ne.s32.totalorder %s642_s28, %s643_s30  ;;  %p648_p7 = scmp.lt.s32.totalorder %s642_s28, %s893_s2 }
  0x28   : > { %515 = vmatmul.msk.f32.vlgmr.msra.gmra.mxu1 %vm237_vm0, %v229_v4  ;;  %517 = vmatmul.msk.f32.vlgmr.msra.gmra.mxu3 %vm237_vm0, %v231_v5  ;;  %p649_p8 = scmp.lt.s32.totalorder %s647_s5, %s643_s30 }
  0x29   : > { %p645_p5 = pnand %p644_p4, %p786_p9 }
  0x2a   : > { %p650_p10 = por %p649_p8, %p648_p7 }
  0x2b   : > { %p646_p6 = pneg %p645_p5 }
  0x2d   : > { %p651_p13 = pnand %p650_p10, %p646_p6 }
  0x2f   : > { %512 = vmatmul.msk.f32.gmra.mxu0 %vm237_vm0, %v230_v6  ;;  %514 = vmatmul.msk.f32.gmra.mxu2 %vm237_vm0, %v232_v7 }
  0x30   : > { %516 = vmatmul.msk.f32.gmra.mxu1 %vm237_vm0, %v230_v6  ;;  %518 = vmatmul.msk.f32.gmra.mxu3 %vm237_vm0, %v232_v7 }
  0xa4   : > { %v267_v8 = vpop.f32.mrf.mxu0 }
  0xa5   : > { %350 = vst [vmem:[%s830_s9] sm:$0xff] %v267_v8  ;;  %v296_v9 = vpop.f32.mrf.mxu1  ;;  %v320_v10 = vmul.f32 %v267_v8, %v267_v8 }
  0xa6   : > { %351 = vst [vmem:[%s830_s9 + $0x8] sm:$0xff] %v296_v9  ;;  %v308_v11 = vadd.f32 %v296_v9, %v267_v8  ;;  %v321_v12 = vmul.f32 %v296_v9, %v296_v9 }
  0xa8   : > { %309 = vadd.xlane.f32.xlu0 %v308_v11  ;;  %v328_v13 = vadd.f32 %v321_v12, %v320_v10 }
  0xaa   : > { %v273_v14 = vpop.f32.mrf.mxu2  ;;  %329 = vadd.xlane.f32.xlu2 %v328_v13 }
  0xab   : > { %354 = vst [vmem:[%s830_s9 + $0x20] sm:$0xff] %v273_v14  ;;  %v302_v15 = vpop.f32.mrf.mxu3  ;;  %v324_v24 = vmul.f32 %v273_v14, %v273_v14 }
  0xac   : > { %355 = vst [vmem:[%s830_s9 + $0x28] sm:$0xff] %v302_v15  ;;  %v270_v16 = vpop.f32.mrf.mxu0  ;;  %v314_v17 = vadd.f32 %v302_v15, %v273_v14  ;;  %v325_v25 = vmul.f32 %v302_v15, %v302_v15 }
  0xad   : > { %v322_v18 = vmul.f32 %v270_v16, %v270_v16  ;;  %352 = vst [vmem:[%s830_s9 + $0x10] sm:$0xff] %v270_v16  ;;  %v299_v19 = vpop.f32.mrf.mxu1 }
  0xae   : > { %v323_v20 = vmul.f32 %v299_v19, %v299_v19  ;;  %353 = vst [vmem:[%s830_s9 + $0x18] sm:$0xff] %v299_v19  ;;  %315 = vadd.xlane.f32.xlu1 %v314_v17  ;;  %v311_v21 = vadd.f32 %v299_v19, %v270_v16 }
  0xb0   : > { %312 = vadd.xlane.f32.xlu0 %v311_v21  ;;  %v331_v22 = vadd.f32 %v323_v20, %v322_v18 }
  0xb2   : > { %v276_v23 = vpop.f32.mrf.mxu2  ;;  %332 = vadd.xlane.f32.xlu2 %v331_v22 }
  0xb3   : > { %356 = vst [vmem:[%s830_s9 + $0x30] sm:$0xff] %v276_v23  ;;  %v305_v26 = vpop.f32.mrf.mxu3 }
  0xb4   : > { %357 = vst [vmem:[%s830_s9 + $0x38] sm:$0xff] %v305_v26  ;;  %v317_v27 = vadd.f32 %v305_v26, %v276_v23 }
  0xb5   : > { %654 = shalt.err (!%p651_p13)
}
  0xb6   : > { %s713_s19 = smov 256   ;;  %s714_s8 = smov 16   ;;  %318 = vadd.xlane.f32.xlu1 %v317_v27  ;;  %v334_v28 = vadd.f32 %v325_v25, %v324_v24  ;;  %v326_v29 = vmul.f32 %v276_v23, %v276_v23  ;;  %v327_v30 = vmul.f32 %v305_v26, %v305_v26  ;;  %vm340_vm1 = vcmask 7168  }
  0xb7   : > { %533 = dma.vmem_to_hbm [thread:$0]  (%p786_p9), %s843_s10, 1024, %s382_s29, %s359_s22, %s713_s19, %s713_s19, %s714_s8   ;;  %vm345_vm2 = vcmask 15360  }
  0xb8   : > { %335 = vadd.xlane.f32.xlu0 %v334_v28  ;;  %v337_v31 = vadd.f32 %v327_v30, %v326_v29  ;;  %p223_p0 = scmp.lt.s32.totalorder %s701_s15, 1 }
  0xba   : > { %s907_s15 = smov (!%p223_p0, %s701_s15), 1 }
  0xbb   : > { %s525_s9 = sshll.u32 %s907_s15, 5 }
  0xbc   : > { %s227_s21 = scalar_lea.vmem %s894_s3, %s525_s9 }
  0xbe   : > { %338 = vadd.xlane.f32.xlu1 %v337_v31 }
 0x11b   : > { %v310_v32 = vpop.xlane.xlu0 %309 }
 0x11d   : > { %v330_v33 = vpop.xlane.xlu2 %329 }
 0x11e   : > { %v341_v34 = vsel %vm340_vm1, %v310_v32, %v330_v33 }
 0x11f   : > { %346 = vst.msk [vmem:[%s227_s21] sm:$0xff] %vm345_vm2, %v341_v34 }
 0x121   : > { %v316_v35 = vpop.xlane.xlu1 %315 }
 0x123   : > { %v313_v36 = vpop.xlane.xlu0 %312 }
 0x125   : > { %v333_v37 = vpop.xlane.xlu2 %332 }
 0x126   : > { %v342_v38 = vsel %vm340_vm1, %v313_v36, %v333_v37 }
 0x127   : > { %347 = vst.msk [vmem:[%s227_s21 + $0x8] sm:$0xff] %vm345_vm2, %v342_v38 }
 0x129   : > { %v319_v39 = vpop.xlane.xlu1 %318 }
 0x12b   : > { %v336_v40 = vpop.xlane.xlu0 %335 }
 0x12c   : > { %v343_v41 = vsel %vm340_vm1, %v316_v35, %v336_v40 }
 0x12d   : > { %348 = vst.msk [vmem:[%s227_s21 + $0x10] sm:$0xff] %vm345_vm2, %v343_v41 }
 0x131   : > { %v339_v42 = vpop.xlane.xlu1 %338 }
 0x132   : > { %v344_v43 = vsel %vm340_vm1, %v319_v39, %v339_v42 }
 0x133   : > { %349 = vst.msk [vmem:[%s227_s21 + $0x18] sm:$0xff] %vm345_vm2, %v344_v43 }
 0x134 PF: > { %s400_s15 = sand.u32 1, %s689_s12   ;;  %p540_p9 = pnand %p502_p12, %p793_p11 }
 0x135   : > { %s401_s25 = scalar_lea.sflag [#allocation4], %s400_s15 }
 0x136   : > { %p541_p1 = pneg %p540_p9 }
 0x138   : > { %684 = dma.done.wait (%p541_p1), %s401_s25, 1024  }
 0x139   : > { %686 = vsyncadd (%p541_p1), %s401_s25, 4294966272  ;;  %s20_s17 = sadd.s32 1, %s709_s17   ;;  %s899_s12 = smov %s693_s13 }
 0x13a   : > { %p17_p2 = scmp.ge.s32.totalorder %s20_s17, 4   ;;  %s900_s13 = smov %s697_s14 }
 0x13b   : > { %s901_s14 = smov %s791_s26  ;;  %s902_s15 = smov %s705_s16 }
 0x13c   : > { %s903_s16 = smov %s905_s20  ;;  %19 = sbr.rel (!%p17_p2) target bundleno = 6 (0x6), region = 85 }
 0x141   :  { %416 = vsyncpa [#allocation3], 1 }
 0x142   :  { %418 = vsyncpa [#allocation3 + $0x1], 1 }
 0x143   :  { %419 = vsyncpa [#allocation4], 1 }
 0x144   :  { %421 = vsyncpa [#allocation4 + $0x1], 1 }

</bundles_post_ra>
